<compile_context>
chip_gen: v5e
topology: v5e:2x2
jax: 0.10.0
libtpu: 0.0.40
codegen_flags: <defaults>
</compile_context>

<pallas_src>
import math
from functools import partial

import jax
import jax.numpy as jnp
from jax.experimental import pallas as pl
from jax.experimental.pallas import tpu as pltpu

_SQRT_2_OVER_PI = math.sqrt(2.0 / math.pi)

_RESIDENT_VMEM_BUDGET = 40 * 1024 * 1024   # keep resident weights well under v7x 64 MiB/TC
_VMEM_CAP = 56 * 1024 * 1024               # never request the full v7x VMEM


def _new_gelu(x):
    # 0.5 * x * (1 + tanh(sqrt(2/pi) * (x + 0.044715 * x^3)))  -- computed in f32.
    return 0.5 * x * (1.0 + jnp.tanh(_SQRT_2_OVER_PI * (x + 0.044715 * (x * x * x))))


def _mlp_kernel_resident(x_ref, wfc_ref, bfc_ref, wproj_ref, bproj_ref, o_ref,
                         *, mxu_dtype):
    # 1-D grid over token tiles. Weight/bias index_maps are constant, so their
    # blocks are DMA'd from HBM once and stay VMEM-resident for the whole grid.
    x = x_ref[...].astype(mxu_dtype)
    wfc = wfc_ref[...].astype(mxu_dtype)
    h = jnp.dot(x, wfc, preferred_element_type=jnp.float32)      # (tn, 4H) f32
    h = h + bfc_ref[...].astype(jnp.float32)
    g = _new_gelu(h)
    wproj = wproj_ref[...].astype(mxu_dtype)
    acc = jnp.dot(g.astype(mxu_dtype), wproj, preferred_element_type=jnp.float32)
    acc = acc + bproj_ref[...].astype(jnp.float32)
    o_ref[...] = acc.astype(o_ref.dtype)


def _mlp_kernel_stream(x_ref, wfc_ref, bfc_ref, wproj_ref, bproj_ref, o_ref,
                       acc_ref, *, mxu_dtype):
    # 2-D grid: (token tiles [parallel], 4H reduction tiles [arbitrary]).
    k = pl.program_id(1)

    @pl.when(k == 0)
    def _init():
        # Fold the c_proj bias into the accumulator init (added exactly once).
        acc_ref[...] = jnp.broadcast_to(
            bproj_ref[...].astype(jnp.float32), acc_ref.shape)

    x = x_ref[...].astype(mxu_dtype)
    wfc = wfc_ref[...].astype(mxu_dtype)
    h = jnp.dot(x, wfc, preferred_element_type=jnp.float32)      # (tn, tk) f32
    h = h + bfc_ref[...].astype(jnp.float32)
    g = _new_gelu(h)
    acc_ref[...] += jnp.dot(g.astype(mxu_dtype), wproj_ref[...].astype(mxu_dtype),
                            preferred_element_type=jnp.float32)

    @pl.when(k == pl.num_programs(1) - 1)
    def _finalize():
        o_ref[...] = acc_ref[...].astype(o_ref.dtype)


def _round_up(x, m):
    return ((x + m - 1) // m) * m


def _pick_tile(dim, candidates):
    for c in candidates:
        if dim % c == 0:
            return c
    return dim  # full dimension is always a legal block size


@partial(jax.jit, static_argnames=("token_tile", "k_tile", "use_bf16_mxu"))
def nanogpt_mlp(hidden_states, wfc_t, b_fc, wproj_t, b_proj, *,
                token_tile=None, k_tile=None, use_bf16_mxu=True):
    """Fused NanoGPT MLP forward.

    hidden_states: [B, T, H]
    wfc_t:   [H, 4H]   (c_fc weight, already transposed from PyTorch [4H, H])
    b_fc:    [4H]
    wproj_t: [4H, H]   (c_proj weight, already transposed from PyTorch [H, 4H])
    b_proj:  [H]
    """
    B, T, H = hidden_states.shape
    H4 = wfc_t.shape[1]
    N = B * T

    x2d = hidden_states.reshape(N, H)
    bfc2 = b_fc.reshape(1, H4)
    bproj2 = b_proj.reshape(1, H)

    out_dtype = hidden_states.dtype
    mxu_dtype = jnp.bfloat16 if use_bf16_mxu else jnp.dtype(hidden_states.dtype)

    x_is = jnp.dtype(hidden_states.dtype).itemsize
    w_is = jnp.dtype(wfc_t.dtype).itemsize
    b_is = jnp.dtype(b_fc.dtype).itemsize

    # ---- token tile ---------------------------------------------------------
    if token_tile is not None:
        assert token_tile % 8 == 0, "token_tile must be a multiple of 8"
        tn = token_tile
    else:
        tn = 256 if N >= 256 else _round_up(max(N, 1), 8)

    def _resident_bytes(tile_n):
        return (4 * tile_n * H * x_is              # x + out tiles, double-buffered
                + 2 * (H * H4 + H4 * H) * w_is     # both weights, double-buffered
                + 2 * (H4 + H) * b_is              # biases
                + 2 * tile_n * H4 * 4              # f32 h / g intermediates
                + tile_n * H * 4)                  # f32 result tile

    resident = (k_tile is None) and (_resident_bytes(tn) <= _RESIDENT_VMEM_BUDGET)

    # When forced to stream the weights, use a larger token tile so the
    # streamed-weight arithmetic intensity sits near/above the roofline knee.
    if (not resident) and (token_tile is None) and N >= 512:
        tn = 512

    # Pad ragged N up to a multiple of the token tile (keeps (8,128) blocks,
    # keeps pipeline depth); padded rows are trimmed after the call.
    N_pad = _round_up(N, tn)
    if N_pad != N:
        x2d = jnp.pad(x2d, ((0, N_pad - N), (0, 0)))

    if resident:
        # ---- weight-resident fast path: 1-D grid over token tiles ----------
        vmem_limit = int(min(max(int(1.25 * _resident_bytes(tn)),
                                 32 * 1024 * 1024), _VMEM_CAP))
        out2d = pl.pallas_call(
            partial(_mlp_kernel_resident, mxu_dtype=mxu_dtype),
            out_shape=jax.ShapeDtypeStruct((N_pad, H), out_dtype),
            grid_spec=pltpu.PrefetchScalarGridSpec(
                num_scalar_prefetch=0,
                grid=(N_pad // tn,),
                in_specs=[
                    pl.BlockSpec((tn, H), lambda i: (i, 0)),    # x tile
                    pl.BlockSpec((H, H4), lambda i: (0, 0)),    # Wfc (resident)
                    pl.BlockSpec((1, H4), lambda i: (0, 0)),    # bfc (resident)
                    pl.BlockSpec((H4, H), lambda i: (0, 0)),    # Wproj (resident)
                    pl.BlockSpec((1, H), lambda i: (0, 0)),     # bproj (resident)
                ],
                out_specs=pl.BlockSpec((tn, H), lambda i: (i, 0)),
            ),
            compiler_params=pltpu.CompilerParams(
                dimension_semantics=("parallel",),
                vmem_limit_bytes=vmem_limit,
            ),
        )(x2d, wfc_t, bfc2, wproj_t, bproj2)
    else:
        # ---- streaming fallback: 2-D grid, f32 accumulator over 4H ---------
        if k_tile is not None:
            assert k_tile == H4 or k_tile % 128 == 0, \
                "k_tile must be a multiple of 128 (or the full 4H)"
            tk = k_tile
        else:
            tk = _pick_tile(H4, (2048, 1024, 512, 256, 128))

        est = (4 * tn * H * x_is            # x + out tiles, double-buffered
               + 2 * H * tk * w_is          # Wfc slice
               + 2 * tk * H * w_is          # Wproj slice
               + 2 * (tk + H) * b_is        # bias slices
               + 2 * tn * tk * 4            # f32 h / g intermediates
               + tn * H * 4)                # f32 accumulator scratch
        vmem_limit = int(min(max(int(1.5 * est), 32 * 1024 * 1024), _VMEM_CAP))

        out2d = pl.pallas_call(
            partial(_mlp_kernel_stream, mxu_dtype=mxu_dtype),
            out_shape=jax.ShapeDtypeStruct((N_pad, H), out_dtype),
            grid_spec=pltpu.PrefetchScalarGridSpec(
                num_scalar_prefetch=0,
                grid=(N_pad // tn, H4 // tk),
                in_specs=[
                    pl.BlockSpec((tn, H), lambda i, k: (i, 0)),   # x (const in k)
                    pl.BlockSpec((H, tk), lambda i, k: (0, k)),   # Wfc slice
                    pl.BlockSpec((1, tk), lambda i, k: (0, k)),   # bfc slice
                    pl.BlockSpec((tk, H), lambda i, k: (k, 0)),   # Wproj slice
                    pl.BlockSpec((1, H), lambda i, k: (0, 0)),    # bproj
                ],
                out_specs=pl.BlockSpec((tn, H), lambda i, k: (i, 0)),
                scratch_shapes=[pltpu.VMEM((tn, H), jnp.float32)],
            ),
            compiler_params=pltpu.CompilerParams(
                dimension_semantics=("parallel", "arbitrary"),
                vmem_limit_bytes=vmem_limit,
            ),
        )(x2d, wfc_t, bfc2, wproj_t, bproj2)

    if N_pad != N:
        out2d = out2d[:N]
    # TODO(synk): training-mode dropout (p > 0) not implemented; forward here
    # matches nn.Dropout in eval/inference (identity).
    return out2d.reshape(B, T, H)


def _ref_mlp(hidden_states, w_fc, b_fc, w_proj, b_proj, mxu_dtype=jnp.bfloat16):
    # Pure-JAX reference mimicking the kernel's numerics: bf16 MXU operands,
    # f32 accumulation, f32 bias + gelu.
    f32 = jnp.float32
    h = jnp.dot(hidden_states.astype(mxu_dtype), w_fc.T.astype(mxu_dtype),
                preferred_element_type=f32) + b_fc.astype(f32)
    g = _new_gelu(h)
    o = jnp.dot(g.astype(mxu_dtype), w_proj.T.astype(mxu_dtype),
                preferred_element_type=f32) + b_proj.astype(f32)
    return o.astype(hidden_states.dtype)


if __name__ == "__main__":
    # Small config consistent with the module: hidden_size=32, bias=True,
    # dropout=0.0 (eval/inference).
    B, T, H = 2, 8, 32
    H4 = 4 * H

    key = jax.random.PRNGKey(0)
    kx, kw1, kb1, kw2, kb2 = jax.random.split(key, 5)

    x = jax.random.normal(kx, (B, T, H), dtype=jnp.float32)
    # Deterministic param init (roughly matches nn.Linear uniform init scale).
    w_fc = jax.random.uniform(kw1, (H4, H), jnp.float32, -1.0, 1.0) / math.sqrt(H)
    b_fc = jax.random.uniform(kb1, (H4,), jnp.float32, -1.0, 1.0) / math.sqrt(H)
    w_proj = jax.random.uniform(kw2, (H, H4), jnp.float32, -1.0, 1.0) / math.sqrt(H4)
    b_proj = jax.random.uniform(kb2, (H,), jnp.float32, -1.0, 1.0) / math.sqrt(H4)

    # Pre-transpose the PyTorch-convention weights ONCE, outside the jitted
    # per-step function (avoids per-call HBM transpose traffic).
    wfc_t = jnp.asarray(w_fc.T)        # (H, 4H)
    wproj_t = jnp.asarray(w_proj.T)    # (4H, H)

    out = nanogpt_mlp(x, wfc_t, b_fc, wproj_t, b_proj)
    jax.block_until_ready(out)

    ref = _ref_mlp(x, w_fc, b_fc, w_proj, b_proj, mxu_dtype=jnp.bfloat16)
    assert out.shape == (B, T, H)
    max_err = float(jnp.max(jnp.abs(out - ref)))
    assert jnp.allclose(out, ref, atol=1e-2, rtol=1e-2), (
        f"mismatch vs reference (max abs err {max_err})")

    print("KERNEL_OK")
</pallas_src>

<mosaic_0001>
module attributes {stable_mosaic.version = 11 : i64} {
  func.func @_mlp_kernel_resident(%arg0: i32, %arg1: memref<16x32xf32, #tpu.memory_space<vmem>>, %arg2: memref<32x128xf32, #tpu.memory_space<vmem>>, %arg3: memref<1x128xf32, #tpu.memory_space<vmem>>, %arg4: memref<128x32xf32, #tpu.memory_space<vmem>>, %arg5: memref<1x32xf32, #tpu.memory_space<vmem>>, %arg6: memref<16x32xf32, #tpu.memory_space<vmem>>) attributes {dimension_semantics = [#tpu.dimension_semantics<parallel>], iteration_bounds = array<i64: 1>, scalar_prefetch = 0 : i64, scratch_operands = 0 : i64, tpu.core_type = #tpu.core_type<tc>, window_params = [{transform_indices = @transform_0, window_bounds = array<i64: 16, 32>}, {pipeline_mode = #tpu.pipeline_mode<synchronous>, transform_indices = @transform_1, window_bounds = array<i64: 32, 128>}, {pipeline_mode = #tpu.pipeline_mode<synchronous>, transform_indices = @transform_2, window_bounds = array<i64: 1, 128>}, {pipeline_mode = #tpu.pipeline_mode<synchronous>, transform_indices = @transform_3, window_bounds = array<i64: 128, 32>}, {pipeline_mode = #tpu.pipeline_mode<synchronous>, transform_indices = @transform_4, window_bounds = array<i64: 1, 32>}, {transform_indices = @transform_5, window_bounds = array<i64: 16, 32>}]} {
    %c0 = arith.constant 0 : index
    %c0_0 = arith.constant 0 : index
    %0 = vector.load %arg1[%c0, %c0_0] : memref<16x32xf32, #tpu.memory_space<vmem>>, vector<16x32xf32>
    %1 = arith.truncf %0 : vector<16x32xf32> to vector<16x32xbf16>
    %c0_1 = arith.constant 0 : index
    %c0_2 = arith.constant 0 : index
    %2 = vector.load %arg2[%c0_1, %c0_2] : memref<32x128xf32, #tpu.memory_space<vmem>>, vector<32x128xf32>
    %3 = arith.truncf %2 : vector<32x128xf32> to vector<32x128xbf16>
    %cst = arith.constant dense<0.000000e+00> : vector<16x128xf32>
    %4 = tpu.matmul %1, %3, %cst {dimension_numbers = #tpu.dot_dimension_numbers<[1], [0], [0], [1], [0, 0, 1, 1], [], []>} : vector<16x32xbf16>, vector<32x128xbf16>, vector<16x128xf32> -> vector<16x128xf32>
    %c0_3 = arith.constant 0 : index
    %c0_4 = arith.constant 0 : index
    %5 = vector.load %arg3[%c0_3, %c0_4] : memref<1x128xf32, #tpu.memory_space<vmem>>, vector<1x128xf32>
    %6 = vector.broadcast %5 : vector<1x128xf32> to vector<16x128xf32>
    %7 = arith.addf %4, %6 : vector<16x128xf32>
    %cst_5 = arith.constant 5.000000e-01 : f32
    %8 = vector.broadcast %cst_5 : f32 to vector<16x128xf32>
    %9 = arith.mulf %8, %7 : vector<16x128xf32>
    %10 = arith.mulf %7, %7 : vector<16x128xf32>
    %11 = arith.mulf %10, %7 : vector<16x128xf32>
    %cst_6 = arith.constant 4.471500e-02 : f32
    %12 = vector.broadcast %cst_6 : f32 to vector<16x128xf32>
    %13 = arith.mulf %12, %11 : vector<16x128xf32>
    %14 = arith.addf %7, %13 : vector<16x128xf32>
    %cst_7 = arith.constant 0.797884583 : f32
    %15 = vector.broadcast %cst_7 : f32 to vector<16x128xf32>
    %16 = arith.mulf %15, %14 : vector<16x128xf32>
    %17 = math.tanh %16 : vector<16x128xf32>
    %cst_8 = arith.constant 1.000000e+00 : f32
    %18 = vector.broadcast %cst_8 : f32 to vector<16x128xf32>
    %19 = arith.addf %18, %17 : vector<16x128xf32>
    %20 = arith.mulf %9, %19 : vector<16x128xf32>
    %c0_9 = arith.constant 0 : index
    %c0_10 = arith.constant 0 : index
    %21 = vector.load %arg4[%c0_9, %c0_10] : memref<128x32xf32, #tpu.memory_space<vmem>>, vector<128x32xf32>
    %22 = arith.truncf %21 : vector<128x32xf32> to vector<128x32xbf16>
    %23 = arith.truncf %20 : vector<16x128xf32> to vector<16x128xbf16>
    %cst_11 = arith.constant dense<0.000000e+00> : vector<16x32xf32>
    %24 = tpu.matmul %23, %22, %cst_11 {dimension_numbers = #tpu.dot_dimension_numbers<[1], [0], [0], [1], [0, 0, 1, 1], [], []>} : vector<16x128xbf16>, vector<128x32xbf16>, vector<16x32xf32> -> vector<16x32xf32>
    %c0_12 = arith.constant 0 : index
    %c0_13 = arith.constant 0 : index
    %25 = vector.load %arg5[%c0_12, %c0_13] : memref<1x32xf32, #tpu.memory_space<vmem>>, vector<1x32xf32>
    %26 = vector.broadcast %25 : vector<1x32xf32> to vector<16x32xf32>
    %27 = arith.addf %24, %26 : vector<16x32xf32>
    %c0_14 = arith.constant 0 : index
    %c0_15 = arith.constant 0 : index
    %28 = vector.load %arg6[%c0_14, %c0_15] : memref<16x32xf32, #tpu.memory_space<vmem>>, vector<16x32xf32>
    tpu.vector_store %arg6[%c0_14, %c0_15], %27 {strides = array<i32>} : memref<16x32xf32, #tpu.memory_space<vmem>>, vector<16x32xf32>,
    return
  }
  func.func @transform_0(%arg0: i32) -> (i32, i32) {
    %c0_i32 = arith.constant 0 : i32
    %c0_i32_0 = arith.constant 0 : i32
    return %arg0, %c0_i32 : i32, i32
  }
  func.func @transform_1(%arg0: i32) -> (i32, i32) {
    %c0_i32 = arith.constant 0 : i32
    %c0_i32_0 = arith.constant 0 : i32
    %c0_i32_1 = arith.constant 0 : i32
    return %c0_i32, %c0_i32_0 : i32, i32
  }
  func.func @transform_2(%arg0: i32) -> (i32, i32) {
    %c0_i32 = arith.constant 0 : i32
    %c0_i32_0 = arith.constant 0 : i32
    %c0_i32_1 = arith.constant 0 : i32
    return %c0_i32, %c0_i32_0 : i32, i32
  }
  func.func @transform_3(%arg0: i32) -> (i32, i32) {
    %c0_i32 = arith.constant 0 : i32
    %c0_i32_0 = arith.constant 0 : i32
    %c0_i32_1 = arith.constant 0 : i32
    return %c0_i32, %c0_i32_0 : i32, i32
  }
  func.func @transform_4(%arg0: i32) -> (i32, i32) {
    %c0_i32 = arith.constant 0 : i32
    %c0_i32_0 = arith.constant 0 : i32
    %c0_i32_1 = arith.constant 0 : i32
    return %c0_i32, %c0_i32_0 : i32, i32
  }
  func.func @transform_5(%arg0: i32) -> (i32, i32) {
    %c0_i32 = arith.constant 0 : i32
    %c0_i32_0 = arith.constant 0 : i32
    return %arg0, %c0_i32 : i32, i32
  }
}

</mosaic_0001>

<bundles_post_ra>
// kernel: nanogpt_mlp.1
= control target key start
LH: loop header
LB: loop body
LE: loop exit
PB: predicated region body
PF: predicated region fallthrough
CT: control target
= control target key end

     0   :  { %s281_s0 = inlined_call_operand.vmem [shape: f32[16,32], index: 0, kind: input, shape index: {}]   ;;  %s282_s1 = inlined_call_operand.vmem [shape: f32[32,128], index: 1, kind: input, shape index: {}]   ;;  %s283_s2 = inlined_call_operand.vmem [shape: f32[1,128], index: 2, kind: input, shape index: {}]   ;;  %s284_s3 = inlined_call_operand.vmem [shape: f32[128,32], index: 3, kind: input, shape index: {}]   ;;  %s285_s4 = inlined_call_operand.vmem [shape: f32[1,32], index: 4, kind: input, shape index: {}]   ;;  %s286_s5 = inlined_call_operand.hbm [shape: f32[16,32], index: 5, kind: output, shape index: {}]  }
   0x1   :  { %v27_v0 = vld [vmem:[%s282_s1 + $0x10] sm:$0xff]  ;;  %v28_v1 = vld [vmem:[%s282_s1 + $0x18] sm:$0xff]  ;;  %v25_v2 = vld [vmem:[%s282_s1] sm:$0xff] }
   0x2   :  { %v30_v3 = vpack.c.bf16 %v28_v1, %v27_v0  ;;  %v26_v4 = vld [vmem:[%s282_s1 + $0x8] sm:$0xff]  ;;  %v22_v6 = vld [vmem:[%s281_s0] sm:$0xff] }
   0x3   :  { %v29_v5 = vpack.c.bf16 %v26_v4, %v25_v2  ;;  %v23_v7 = vld [vmem:[%s281_s0 + $0x8] sm:$0xff] }
   0x4   :  { %45 = vmatpush.bf16.msra.mxu0 %v30_v3 }
   0x5   :  { %10 = vsyncpa [#allocation3], 0  ;;  %v24_v8 = vpack.c.bf16 %v23_v7, %v22_v6  ;;  %vm35_vm0 = vcmask 261120   ;;  %v85_v9 = vld [vmem:[%s284_s3 + $0x70] sm:$0xff]  ;;  %v86_v10 = vld [vmem:[%s284_s3 + $0x78] sm:$0xff]  ;;  %s170_s10 = smov [#allocation2]  }
   0x6   :  { %v94_v11 = vpack.c.bf16 %v86_v10, %v85_v9  ;;  %v83_v12 = vld [vmem:[%s284_s3 + $0x60] sm:$0xff]  ;;  %v84_v13 = vld [vmem:[%s284_s3 + $0x68] sm:$0xff]  ;;  %v81_v15 = vld [vmem:[%s284_s3 + $0x50] sm:$0xff]  ;;  %s120_s11 = sshll.u32 %s170_s10, 4  ;;  %s122_s14 = sshll.u32 %s286_s5, 4  ;;  %s121_s11 = int_to_ptr.vmem [resolvable:$true] %s120_s11  ;;  %s123_s14 = int_to_ptr.hbm [resolvable:$true] %s122_s14 }
   0x7   :  { %v93_v14 = vpack.c.bf16 %v84_v13, %v83_v12  ;;  %v82_v16 = vld [vmem:[%s284_s3 + $0x58] sm:$0xff]  ;;  %v79_v18 = vld [vmem:[%s284_s3 + $0x40] sm:$0xff]  ;;  %v80_v19 = vld [vmem:[%s284_s3 + $0x48] sm:$0xff]  ;;  %s171_s15 = smov 128   ;;  %s172_s16 = smov 8  }
   0x8   :  { %46 = vmatpush.bf16.msra.mxu0 %v29_v5  ;;  %100 = vmatpush.bf16.msra.mxu1 %v94_v11  ;;  %v92_v17 = vpack.c.bf16 %v82_v16, %v81_v15  ;;  %v91_v20 = vpack.c.bf16 %v80_v19, %v79_v18  ;;  %v77_v21 = vld [vmem:[%s284_s3 + $0x30] sm:$0xff]  ;;  %v78_v22 = vld [vmem:[%s284_s3 + $0x38] sm:$0xff]  ;;  %v75_v24 = vld [vmem:[%s284_s3 + $0x20] sm:$0xff] }
   0x9   :  { %v90_v23 = vpack.c.bf16 %v78_v22, %v77_v21  ;;  %v76_v25 = vld [vmem:[%s284_s3 + $0x28] sm:$0xff]  ;;  %v73_v27 = vld [vmem:[%s284_s3 + $0x10] sm:$0xff]  ;;  %v74_v28 = vld [vmem:[%s284_s3 + $0x18] sm:$0xff] }
   0xa   :  { %v89_v26 = vpack.c.bf16 %v76_v25, %v75_v24  ;;  %v88_v29 = vpack.c.bf16 %v74_v28, %v73_v27  ;;  %v71_v30 = vld [vmem:[%s284_s3] sm:$0xff]  ;;  %v72_v31 = vld [vmem:[%s284_s3 + $0x8] sm:$0xff] }
   0xb   :  { %134 = vmatmul.msk.bf16.vlgmr.msra.gmra.mxu0 %vm35_vm0, %v24_v8  ;;  %v87_v32 = vpack.c.bf16 %v72_v31, %v71_v30  ;;  %v138_v33 = vld [vmem:[%s283_s2] ss:$0 sm:$0xff] }
   0xc   :  { %101 = vmatpush.bf16.msra.mxu1 %v93_v14  ;;  %v139_v57 = vld [vmem:[%s285_s4] ss:$0 sm:$0xff] }
  0x10   :  { %102 = vmatpush.bf16.msra.mxu1 %v92_v17 }
  0x14   :  { %103 = vmatpush.bf16.msra.mxu1 %v91_v20 }
  0x18   :  { %104 = vmatpush.bf16.msra.mxu1 %v90_v23 }
  0x1c   :  { %105 = vmatpush.bf16.msra.mxu1 %v89_v26 }
  0x20   :  { %106 = vmatpush.bf16.msra.mxu1 %v88_v29 }
  0x24   :  { %107 = vmatpush.bf16.msra.mxu1 %v87_v32 }
  0x88   :  { %v48_v34 = vpop.f32.mrf.mxu0 }
  0x89   :  { %v49_v35 = vadd.f32 %v138_v33, %v48_v34 }
  0x8b   :  { %v55_v36 = vmul.f32 %v49_v35, %v49_v35  ;;  %v53_v51 = vmul.f32 0.5, %v49_v35 }
  0x8d   :  { %v57_v37 = vmul.f32 %v55_v36, %v49_v35 }
  0x8f   :  { %v59_v38 = vmul.f32 0.044715, %v57_v37 }
  0x90   :  { %v50_v39 = vpop.f32.mrf.mxu0 }
  0x91   :  { %v51_v40 = vadd.f32 %v138_v33, %v50_v39  ;;  %v61_v41 = vadd.f32 %v59_v38, %v49_v35 }
  0x93   :  { %v56_v42 = vmul.f32 %v51_v40, %v51_v40  ;;  %v63_v44 = vmul.f32 0.7978846, %v61_v41  ;;  %v54_v52 = vmul.f32 0.5, %v51_v40 }
  0x95   :  { %v58_v43 = vmul.f32 %v56_v42, %v51_v40  ;;  %140 = vtanh.f32 %v63_v44 }
  0x97   :  { %v60_v45 = vmul.f32 0.044715, %v58_v43 }
  0x99   :  { %v62_v46 = vadd.f32 %v60_v45, %v51_v40 }
  0x9b   :  { %v64_v47 = vmul.f32 0.7978846, %v62_v46  ;;  %v141_v48 = vpop.eup %140 }
  0x9c   :  { %v67_v49 = vadd.f32 1.0, %v141_v48 }
  0x9d   :  { %142 = vtanh.f32 %v64_v47 }
  0x9e   :  { %v69_v54 = vmul.f32 %v67_v49, %v53_v51 }
  0xa3   :  { %v143_v50 = vpop.eup %142 }
  0xa4   :  { %v68_v53 = vadd.f32 1.0, %v143_v50 }
  0xa6   :  { %v70_v55 = vmul.f32 %v68_v53, %v54_v52 }
  0xa8   :  { %v95_v56 = vpack.c.bf16 %v70_v55, %v69_v54 }
  0xaa   :  { %108 = vmatmul.bf16.vlgmr.msra.gmra.mxu1 %v95_v56 }
 0x127   :  { %v109_v58 = vpop.f32.mrf.mxu1 }
 0x128   :  { %v110_v59 = vadd.f32 %v139_v57, %v109_v58 }
 0x12a   :  { %114 = vst.msk [vmem:[#allocation2] sm:$0xff] %vm35_vm0, %v110_v59 }
 0x12f   :  { %v111_v60 = vpop.f32.mrf.mxu1 }
 0x130   :  { %v112_v61 = vadd.f32 %v139_v57, %v111_v60 }
 0x132   :  { %115 = vst.msk [vmem:[#allocation2 + $0x8] sm:$0xff] %vm35_vm0, %v112_v61 }
 0x133   :  { %128 = dma.vmem_to_hbm [thread:$0]  %s121_s11, 256, %s123_s14, [#allocation3], %s171_s15, %s171_s15, %s172_s16  }
 0x134   :  { %168 = dma.done.wait [#allocation3], 256  }
 0x135   :  { %169 = vsyncadd [#allocation3], 4294967040 }
 0x136   :  { %133 = vsyncpa [#allocation3], 1 }

</bundles_post_ra>
